<compile_context>
chip_gen: v6e
topology: v6e:2x2x1
jax: 0.10.0
libtpu: 0.0.40
codegen_flags: <defaults>
</compile_context>

<pallas_src>
import jax
import jax.numpy as jnp
from jax.experimental import pallas as pl
from jax.experimental.pallas import tpu as pltpu


def _round_up(x, m):
    return ((x + m - 1) // m) * m


def _pad_to(a, shape, dtype):
    """Zero-pad `a` to `shape` and cast; avoids a copy when already sized."""
    if tuple(a.shape) == tuple(shape):
        return a.astype(dtype)
    out = jnp.zeros(shape, dtype)
    return out.at[tuple(slice(0, s) for s in a.shape)].set(a.astype(dtype))


def _encoder_mlp_kernel(x_ref, w1_ref, b1_ref, w2_ref, b2_ref, w3_ref, b3_ref,
                        o_ref):
    """Fused 3-layer MLP on one (TB, D) batch tile with resident weights."""
    # x arrives f32; cast to bf16 on the VPU right before the MXU.
    x = x_ref[...].astype(jnp.bfloat16)              # (TB, D)

    h1 = jnp.dot(x, w1_ref[...], preferred_element_type=jnp.float32)
    h1 = jnp.maximum(h1 + b1_ref[...], 0.0).astype(jnp.bfloat16)

    h2 = jnp.dot(h1, w2_ref[...], preferred_element_type=jnp.float32)
    h2 = jnp.maximum(h2 + b2_ref[...], 0.0).astype(jnp.bfloat16)

    out = jnp.dot(h2, w3_ref[...], preferred_element_type=jnp.float32)
    o_ref[...] = (out + b3_ref[...]).astype(o_ref.dtype)


def _pick_batch_tile(B, D, E_p, resident_bytes):
    """Largest batch tile whose double-buffered x/out tiles + resident weights
    stay under a conservative scoped-VMEM budget (safe on v5e/v6e/v7x)."""
    budget = 24 * 1024 * 1024
    tb = 8
    for cand in (512, 256, 128, 64, 32, 16, 8):
        tile_bytes = 2 * cand * D * 4 + 2 * cand * E_p * 4   # x (f32) + out (f32)
        if resident_bytes + tile_bytes <= budget:
            tb = cand
            break
    # Don't use a tile larger than the (8-rounded) batch.
    return max(8, min(tb, _round_up(B, 8)))


def encoder_forward(x, params):
    """_Encoder.forward with input_layer=None.

    x: (B, C, H, W) float32 (NCHW, as in PyTorch).
    params: dict of w1,b1,w2,b2,w3,b3 with weights stored (in_dim, out_dim).
    """
    B = x.shape[0]
    # Glue: nn.Flatten() — row-major flatten of all non-batch dims (free reshape).
    x_flat = x.reshape(B, -1)
    D = x_flat.shape[1]

    w1, b1 = params["w1"], params["b1"]
    w2, b2 = params["w2"], params["b2"]
    w3, b3 = params["w3"], params["b3"]
    H1, H2, E = w1.shape[1], w2.shape[1], w3.shape[1]

    # Lane-dense padding of the (small) parameter tensors only.
    H1_p, H2_p, E_p = (_round_up(d, 128) for d in (H1, H2, E))

    f32, bf16 = jnp.float32, jnp.bfloat16
    w1p = _pad_to(w1, (D, H1_p), bf16)
    w2p = _pad_to(w2, (H1_p, H2_p), bf16)
    w3p = _pad_to(w3, (H2_p, E_p), bf16)
    b1p = _pad_to(b1, (1, H1_p), f32)
    b2p = _pad_to(b2, (1, H2_p), f32)
    b3p = _pad_to(b3, (1, E_p), f32)

    resident_bytes = (w1p.size + w2p.size + w3p.size) * 2 \
        + (b1p.size + b2p.size + b3p.size) * 4
    TB = _pick_batch_tile(B, D, E_p, resident_bytes)
    grid = (pl.cdiv(B, TB),)

    flops = 2 * B * (D * H1_p + H1_p * H2_p + H2_p * E_p)
    bytes_accessed = (x_flat.size * 4 + resident_bytes + B * E_p * 4)

    out = pl.pallas_call(
        _encoder_mlp_kernel,
        out_shape=jax.ShapeDtypeStruct((B, E_p), jnp.float32),
        grid_spec=pltpu.PrefetchScalarGridSpec(
            num_scalar_prefetch=0,
            grid=grid,
            in_specs=[
                # Streamed batch tiles of x (f32, unpadded; edge block masked).
                pl.BlockSpec((TB, D), lambda i: (i, 0)),
                # Weight-stationary params: same block index every grid step,
                # so they are fetched once and stay VMEM-resident.
                pl.BlockSpec((D, H1_p), lambda i: (0, 0)),
                pl.BlockSpec((1, H1_p), lambda i: (0, 0)),
                pl.BlockSpec((H1_p, H2_p), lambda i: (0, 0)),
                pl.BlockSpec((1, H2_p), lambda i: (0, 0)),
                pl.BlockSpec((H2_p, E_p), lambda i: (0, 0)),
                pl.BlockSpec((1, E_p), lambda i: (0, 0)),
            ],
            out_specs=pl.BlockSpec((TB, E_p), lambda i: (i, 0)),
        ),
        compiler_params=pltpu.CompilerParams(
            # Shard the batch loop across TensorCores on v7x megacore.
            dimension_semantics=("parallel",),
            # Safe on all chips (>= default on v6e/v7x, raises v5e's 16 MiB).
            vmem_limit_bytes=32 * 1024 * 1024,
        ),
        cost_estimate=pl.CostEstimate(
            flops=flops, transcendentals=0, bytes_accessed=bytes_accessed),
    )(x_flat, w1p, b1p, w2p, b2p, w3p, b3p)

    # Strip lane padding of the encoding dim.
    return out[:, :E] if E != E_p else out


def init_params(key, input_dim, enc_dim, step_dim):
    """Deterministic synthetic parameters matching the nn.Linear shapes.

    Weights are stored as (in_dim, out_dim) (transpose of torch's (out, in))
    so the kernel computes x @ W + b directly. Biases are kept 2D (1, out).
    """
    h1 = enc_dim + 2 * step_dim
    h2 = enc_dim + step_dim
    k = jax.random.split(key, 6)
    scale1 = 1.0 / jnp.sqrt(input_dim)
    scale2 = 1.0 / jnp.sqrt(h1)
    scale3 = 1.0 / jnp.sqrt(h2)
    return {
        "w1": jax.random.uniform(k[0], (input_dim, h1), jnp.float32, -scale1, scale1),
        "b1": jax.random.uniform(k[1], (1, h1), jnp.float32, -scale1, scale1),
        "w2": jax.random.uniform(k[2], (h1, h2), jnp.float32, -scale2, scale2),
        "b2": jax.random.uniform(k[3], (1, h2), jnp.float32, -scale2, scale2),
        "w3": jax.random.uniform(k[4], (h2, enc_dim), jnp.float32, -scale3, scale3),
        "b3": jax.random.uniform(k[5], (1, enc_dim), jnp.float32, -scale3, scale3),
    }


if __name__ == "__main__":
    key = jax.random.PRNGKey(0)
    kx, kp = jax.random.split(key)

    # Small NCHW input consistent with the module's Flatten-first MLP.
    B, C, H, W = 2, 4, 16, 16
    input_dim = C * H * W          # 1024
    enc_dim, step_dim = 32, 8      # hidden dims: 48 -> 40 -> 32

    x = jax.random.normal(kx, (B, C, H, W), dtype=jnp.float32)
    params = init_params(kp, input_dim, enc_dim, step_dim)

    out = encoder_forward(x, params)
    out = jax.block_until_ready(out)
    assert out.shape == (B, enc_dim)

    # Reference 1: same bf16-input / f32-accumulate path as the kernel.
    bf16 = jnp.bfloat16
    x_flat = x.reshape(B, -1)
    h1 = jnp.maximum(
        jnp.dot(x_flat.astype(bf16), params["w1"].astype(bf16),
                preferred_element_type=jnp.float32) + params["b1"], 0.0)
    h2 = jnp.maximum(
        jnp.dot(h1.astype(bf16), params["w2"].astype(bf16),
                preferred_element_type=jnp.float32) + params["b2"], 0.0)
    ref_bf16 = jnp.dot(h2.astype(bf16), params["w3"].astype(bf16),
                       preferred_element_type=jnp.float32) + params["b3"]
    assert jnp.allclose(out, ref_bf16, atol=2e-3, rtol=2e-3)

    # Reference 2: full-f32 module semantics (loose tol for bf16 weights).
    h1f = jnp.maximum(x_flat @ params["w1"] + params["b1"], 0.0)
    h2f = jnp.maximum(h1f @ params["w2"] + params["b2"], 0.0)
    ref_f32 = h2f @ params["w3"] + params["b3"]
    assert jnp.allclose(out, ref_f32, atol=1e-1)

    print("KERNEL_OK")
</pallas_src>

<mosaic_0001>
module attributes {stable_mosaic.version = 11 : i64} {
  func.func @_encoder_mlp_kernel(%arg0: i32, %arg1: memref<8x1024xf32, #tpu.memory_space<vmem>>, %arg2: memref<1024x128xbf16, #tpu.memory_space<vmem>>, %arg3: memref<1x128xf32, #tpu.memory_space<vmem>>, %arg4: memref<128x128xbf16, #tpu.memory_space<vmem>>, %arg5: memref<1x128xf32, #tpu.memory_space<vmem>>, %arg6: memref<128x128xbf16, #tpu.memory_space<vmem>>, %arg7: memref<1x128xf32, #tpu.memory_space<vmem>>, %arg8: memref<8x128xf32, #tpu.memory_space<vmem>>) attributes {dimension_semantics = [#tpu.dimension_semantics<parallel>], iteration_bounds = array<i64: 1>, scalar_prefetch = 0 : i64, scratch_operands = 0 : i64, tpu.core_type = #tpu.core_type<tc>, window_params = [{transform_indices = @transform_0, window_bounds = array<i64: 8, 1024>}, {pipeline_mode = #tpu.pipeline_mode<synchronous>, transform_indices = @transform_1, window_bounds = array<i64: 1024, 128>}, {pipeline_mode = #tpu.pipeline_mode<synchronous>, transform_indices = @transform_2, window_bounds = array<i64: 1, 128>}, {pipeline_mode = #tpu.pipeline_mode<synchronous>, transform_indices = @transform_3, window_bounds = array<i64: 128, 128>}, {pipeline_mode = #tpu.pipeline_mode<synchronous>, transform_indices = @transform_4, window_bounds = array<i64: 1, 128>}, {pipeline_mode = #tpu.pipeline_mode<synchronous>, transform_indices = @transform_5, window_bounds = array<i64: 128, 128>}, {pipeline_mode = #tpu.pipeline_mode<synchronous>, transform_indices = @transform_6, window_bounds = array<i64: 1, 128>}, {transform_indices = @transform_7, window_bounds = array<i64: 8, 128>}]} {
    %c0 = arith.constant 0 : index
    %c0_0 = arith.constant 0 : index
    %0 = vector.load %arg1[%c0, %c0_0] : memref<8x1024xf32, #tpu.memory_space<vmem>>, vector<8x1024xf32>
    %1 = arith.truncf %0 : vector<8x1024xf32> to vector<8x1024xbf16>
    %c0_1 = arith.constant 0 : index
    %c0_2 = arith.constant 0 : index
    %2 = vector.load %arg2[%c0_1, %c0_2] : memref<1024x128xbf16, #tpu.memory_space<vmem>>, vector<1024x128xbf16>
    %cst = arith.constant dense<0.000000e+00> : vector<8x128xf32>
    %3 = tpu.matmul %1, %2, %cst {dimension_numbers = #tpu.dot_dimension_numbers<[1], [0], [0], [1], [0, 0, 1, 1], [], []>} : vector<8x1024xbf16>, vector<1024x128xbf16>, vector<8x128xf32> -> vector<8x128xf32>
    %c0_3 = arith.constant 0 : index
    %c0_4 = arith.constant 0 : index
    %4 = vector.load %arg3[%c0_3, %c0_4] : memref<1x128xf32, #tpu.memory_space<vmem>>, vector<1x128xf32>
    %5 = vector.broadcast %4 : vector<1x128xf32> to vector<8x128xf32>
    %6 = arith.addf %3, %5 : vector<8x128xf32>
    %cst_5 = arith.constant 0.000000e+00 : f32
    %7 = vector.broadcast %cst_5 : f32 to vector<8x128xf32>
    %8 = arith.maximumf %6, %7 : vector<8x128xf32>
    %9 = arith.truncf %8 : vector<8x128xf32> to vector<8x128xbf16>
    %c0_6 = arith.constant 0 : index
    %c0_7 = arith.constant 0 : index
    %10 = vector.load %arg4[%c0_6, %c0_7] : memref<128x128xbf16, #tpu.memory_space<vmem>>, vector<128x128xbf16>
    %cst_8 = arith.constant dense<0.000000e+00> : vector<8x128xf32>
    %11 = tpu.matmul %9, %10, %cst_8 {dimension_numbers = #tpu.dot_dimension_numbers<[1], [0], [0], [1], [0, 0, 1, 1], [], []>} : vector<8x128xbf16>, vector<128x128xbf16>, vector<8x128xf32> -> vector<8x128xf32>
    %c0_9 = arith.constant 0 : index
    %c0_10 = arith.constant 0 : index
    %12 = vector.load %arg5[%c0_9, %c0_10] : memref<1x128xf32, #tpu.memory_space<vmem>>, vector<1x128xf32>
    %13 = vector.broadcast %12 : vector<1x128xf32> to vector<8x128xf32>
    %14 = arith.addf %11, %13 : vector<8x128xf32>
    %cst_11 = arith.constant 0.000000e+00 : f32
    %15 = vector.broadcast %cst_11 : f32 to vector<8x128xf32>
    %16 = arith.maximumf %14, %15 : vector<8x128xf32>
    %17 = arith.truncf %16 : vector<8x128xf32> to vector<8x128xbf16>
    %c0_12 = arith.constant 0 : index
    %c0_13 = arith.constant 0 : index
    %18 = vector.load %arg6[%c0_12, %c0_13] : memref<128x128xbf16, #tpu.memory_space<vmem>>, vector<128x128xbf16>
    %cst_14 = arith.constant dense<0.000000e+00> : vector<8x128xf32>
    %19 = tpu.matmul %17, %18, %cst_14 {dimension_numbers = #tpu.dot_dimension_numbers<[1], [0], [0], [1], [0, 0, 1, 1], [], []>} : vector<8x128xbf16>, vector<128x128xbf16>, vector<8x128xf32> -> vector<8x128xf32>
    %c0_15 = arith.constant 0 : index
    %c0_16 = arith.constant 0 : index
    %20 = vector.load %arg7[%c0_15, %c0_16] : memref<1x128xf32, #tpu.memory_space<vmem>>, vector<1x128xf32>
    %21 = vector.broadcast %20 : vector<1x128xf32> to vector<8x128xf32>
    %22 = arith.addf %19, %21 : vector<8x128xf32>
    %c0_17 = arith.constant 0 : index
    %c0_18 = arith.constant 0 : index
    %23 = vector.load %arg8[%c0_17, %c0_18] : memref<8x128xf32, #tpu.memory_space<vmem>>, vector<8x128xf32>
    tpu.vector_store %arg8[%c0_17, %c0_18], %22 {strides = array<i32>} : memref<8x128xf32, #tpu.memory_space<vmem>>, vector<8x128xf32>,
    return
  }
  func.func @transform_0(%arg0: i32) -> (i32, i32) {
    %c0_i32 = arith.constant 0 : i32
    %c0_i32_0 = arith.constant 0 : i32
    return %arg0, %c0_i32 : i32, i32
  }
  func.func @transform_1(%arg0: i32) -> (i32, i32) {
    %c0_i32 = arith.constant 0 : i32
    %c0_i32_0 = arith.constant 0 : i32
    %c0_i32_1 = arith.constant 0 : i32
    return %c0_i32, %c0_i32_0 : i32, i32
  }
  func.func @transform_2(%arg0: i32) -> (i32, i32) {
    %c0_i32 = arith.constant 0 : i32
    %c0_i32_0 = arith.constant 0 : i32
    %c0_i32_1 = arith.constant 0 : i32
    return %c0_i32, %c0_i32_0 : i32, i32
  }
  func.func @transform_3(%arg0: i32) -> (i32, i32) {
    %c0_i32 = arith.constant 0 : i32
    %c0_i32_0 = arith.constant 0 : i32
    %c0_i32_1 = arith.constant 0 : i32
    return %c0_i32, %c0_i32_0 : i32, i32
  }
  func.func @transform_4(%arg0: i32) -> (i32, i32) {
    %c0_i32 = arith.constant 0 : i32
    %c0_i32_0 = arith.constant 0 : i32
    %c0_i32_1 = arith.constant 0 : i32
    return %c0_i32, %c0_i32_0 : i32, i32
  }
  func.func @transform_5(%arg0: i32) -> (i32, i32) {
    %c0_i32 = arith.constant 0 : i32
    %c0_i32_0 = arith.constant 0 : i32
    %c0_i32_1 = arith.constant 0 : i32
    return %c0_i32, %c0_i32_0 : i32, i32
  }
  func.func @transform_6(%arg0: i32) -> (i32, i32) {
    %c0_i32 = arith.constant 0 : i32
    %c0_i32_0 = arith.constant 0 : i32
    %c0_i32_1 = arith.constant 0 : i32
    return %c0_i32, %c0_i32_0 : i32, i32
  }
  func.func @transform_7(%arg0: i32) -> (i32, i32) {
    %c0_i32 = arith.constant 0 : i32
    %c0_i32_0 = arith.constant 0 : i32
    return %arg0, %c0_i32 : i32, i32
  }
}

</mosaic_0001>

<bundles_post_ra>
// kernel: tpu_custom_call.1
= control target key start
LH: loop header
LB: loop body
LE: loop exit
PB: predicated region body
PF: predicated region fallthrough
CT: control target
= control target key end

     0   :  { %12 = vsyncpa [#allocation3], 0  ;;  %s1670_s0 = inlined_call_operand.hbm [shape: f32[2,1024], index: 0, kind: input, shape index: {}]   ;;  %s1671_s1 = inlined_call_operand.hbm [shape: bf16[1024,128], index: 1, kind: input, shape index: {}]   ;;  %s1672_s2 = inlined_call_operand.vmem [shape: f32[1,128], index: 2, kind: input, shape index: {}]   ;;  %s1673_s3 = inlined_call_operand.hbm [shape: bf16[128,128], index: 3, kind: input, shape index: {}]   ;;  %s1674_s4 = inlined_call_operand.vmem [shape: f32[1,128], index: 4, kind: input, shape index: {}]   ;;  %s1675_s5 = inlined_call_operand.hbm [shape: bf16[128,128], index: 5, kind: input, shape index: {}]   ;;  %s1676_s6 = inlined_call_operand.vmem [shape: f32[1,128], index: 6, kind: input, shape index: {}]   ;;  %s1677_s7 = inlined_call_operand.hbm [shape: f32[2,128], index: 7, kind: output, shape index: {}]  }
   0x1   :  { %13 = vsyncpa [#allocation6], 0 }
   0x2   :  { %14 = vsyncpa [#allocation9], 0 }
   0x3   :  { %15 = vsyncpa [#allocation4], 0 }
   0x4   :  { %20 = vsyncadd [#allocation3], 768  ;;  %s1555_s24 = smov [#allocation5]  }
   0x5   :  { %s33_s25 = sshll.u32 %s1555_s24, 4  ;;  %s34_s25 = int_to_ptr.vmem [resolvable:$true] %s33_s25 }
   0x6   :  { %s1455_s26 = scalar_lea.vmem %s34_s25, 8192  ;;  %p1460_p1 = scmp.lt.s32.totalorder %s34_s25, %s34_s25 }
   0x7   :  { %p1456_p0 = scmp.ne.s32.totalorder %s34_s25, %s1455_s26  ;;  %p1461_p2 = scmp.lt.s32.totalorder %s1455_s26, %s1455_s26 }
   0x9   :  { %p1462_p3 = por %p1461_p2, %p1460_p1 }
   0xb   :  { %p1463_p4 = pnand %p1462_p3, %p1456_p0 }
   0xd   :  { %1466 = shalt.err (!%p1463_p4)
}
   0xe   :  { %s1556_s27 = smov 64   ;;  %s1557_s28 = smov 4  }
   0xf   :  { %39 = dma.hbm_to_vmem [thread:$0]  %s1671_s1, 8192, %s34_s25, [#allocation6], %s1556_s27, %s1556_s27, %s1557_s28  }
  0x10   :  { %s1558_s8 = smov [#allocation2]  }
  0x11   :  { %s21_s9 = sshll.u32 %s1558_s8, 4  ;;  %s22_s9 = int_to_ptr.vmem [resolvable:$true] %s21_s9 }
  0x12   :  { %s1475_s10 = scalar_lea.vmem %s22_s9, 256  ;;  %s1479_s11 = scalar_lea.vmem %s22_s9, 1024 }
  0x13   :  { %p1476_p5 = scmp.ne.s32.totalorder %s22_s9, %s1475_s10  ;;  %p1480_p6 = scmp.lt.s32.totalorder %s22_s9, %s22_s9 }
  0x14   :  { %p1481_p7 = scmp.lt.s32.totalorder %s1479_s11, %s1475_s10 }
  0x16   :  { %p1482_p8 = por %p1481_p7, %p1480_p6 }
  0x18   :  { %p1483_p9 = pnand %p1482_p8, %p1476_p5 }
  0x1a   :  { %1486 = shalt.err (!%p1483_p9)
}
  0x1b   :  { %s1559_s12 = smov 256   ;;  %s1560_s13 = smov 16  }
  0x1c   :  { %27 = dma.hbm_to_vmem [thread:$0]  %s1670_s0, 256, %s22_s9, [#allocation3], %s1559_s12, %s1559_s12, %s1560_s13  }
  0x1d   :  { %s1561_s16 = smov [#allocation7]   ;;  %s1562_s1 = smov [#allocation8]  }
  0x1e   :  { %s47_s17 = sshll.u32 %s1561_s16, 4  ;;  %s61_s18 = sshll.u32 %s1562_s1, 4  ;;  %s48_s17 = int_to_ptr.vmem [resolvable:$true] %s47_s17  ;;  %s62_s18 = int_to_ptr.vmem [resolvable:$true] %s61_s18 }
  0x1f   :  { %s1495_s19 = scalar_lea.vmem %s48_s17, 1024  ;;  %p1500_p11 = scmp.lt.s32.totalorder %s48_s17, %s48_s17 }
  0x20   :  { %p1496_p10 = scmp.ne.s32.totalorder %s48_s17, %s1495_s19  ;;  %p1501_p12 = scmp.lt.s32.totalorder %s1495_s19, %s1495_s19 }
  0x22   :  { %p1502_p13 = por %p1501_p12, %p1500_p11 }
  0x24   :  { %p1503_p0 = pnand %p1502_p13, %p1496_p10 }
  0x26   :  { %1506 = shalt.err (!%p1503_p0)
}
  0x27   :  { %53 = dma.hbm_to_vmem [thread:$0]  %s1673_s3, 1024, %s48_s17, [#allocation6], %s1556_s27, %s1556_s27, %s1557_s28  }
  0x28   :  { %s1515_s0 = scalar_lea.vmem %s62_s18, 1024  ;;  %p1520_p2 = scmp.lt.s32.totalorder %s62_s18, %s62_s18 }
  0x29   :  { %p1516_p1 = scmp.ne.s32.totalorder %s62_s18, %s1515_s0  ;;  %p1521_p3 = scmp.lt.s32.totalorder %s1515_s0, %s1515_s0 }
  0x2b   :  { %p1522_p4 = por %p1521_p3, %p1520_p2 }
  0x2d   :  { %p1523_p5 = pnand %p1522_p4, %p1516_p1 }
  0x2f   :  { %1526 = shalt.err (!%p1523_p5)
}
  0x30   :  { %67 = dma.hbm_to_vmem [thread:$0]  %s1675_s5, 1024, %s62_s18, [#allocation9], %s1556_s27, %s1556_s27, %s1557_s28  }
  0x31   :  { %1547 = dma.done.wait [#allocation3], 1024  }
  0x32   :  { %1548 = vsyncadd [#allocation3], 4294966272 }
  0x33   :  { %1549 = dma.done.wait [#allocation6], 9216  }
  0x34   :  { %1550 = vsyncadd [#allocation6], 4294958080 }
  0x35   :  { %1551 = dma.done.wait [#allocation9], 1024  }
  0x36   :  { %1552 = vsyncadd [#allocation9], 4294966272  ;;  %v1355_v0 = vld [vmem:[#allocation5 + $0x78] sm:$0xff]   ;;  %v1359_v4 = vld [vmem:[#allocation5 + $0x70] sm:$0xff]   ;;  %v1563_v24 = vmov 1983009808   ;;  %v106_v26 = vlaneseq }
  0x37   :  { %v1356_v1 = vld [vmem:[#allocation5 + $0xf8] sm:$0xff]   ;;  %1195 = vmatprep.subr.bf16.mxu0 %v1355_v0  ;;  %v1360_v5 = vld [vmem:[#allocation5 + $0xf0] sm:$0xff]   ;;  %v1363_v8 = vld [vmem:[#allocation5 + $0x68] sm:$0xff]   ;;  %v104_v25 = vunpack.c.l.s4 %v1563_v24  ;;  %vm1565_vm0 = vmmov 0  }
  0x38   :  { %v1357_v2 = vld [vmem:[#allocation5 + $0x38] sm:$0xff]   ;;  %1217 = vmatprep.subr.bf16.mxu1 %v1356_v1  ;;  %v1361_v6 = vld [vmem:[#allocation5 + $0x30] sm:$0xff]   ;;  %v1364_v9 = vld [vmem:[#allocation5 + $0xe8] sm:$0xff]   ;;  %v107_v32 = vshrl.u32 %v106_v26, 7 }
  0x39   :  { %v1358_v3 = vld [vmem:[#allocation5 + $0xb8] sm:$0xff]   ;;  %1196 = vmatpush3.bf16.msra.mxu0 %v1357_v2  ;;  %v1362_v7 = vld [vmem:[#allocation5 + $0xb0] sm:$0xff]   ;;  %v1365_v10 = vld [vmem:[#allocation5 + $0x28] sm:$0xff]   ;;  %v105_v31 = vunpack.c.0.s8 %v104_v25 }
  0x3a   :  { %1218 = vmatpush3.bf16.msra.mxu1 %v1358_v3  ;;  %1197 = vmatprep.subr.bf16.mxu0 %v1359_v4  ;;  %v1366_v11 = vld [vmem:[#allocation5 + $0xa8] sm:$0xff]   ;;  %v1367_v12 = vld [vmem:[#allocation5 + $0x60] sm:$0xff]   ;;  %v1371_v16 = vld [vmem:[#allocation5 + $0x58] sm:$0xff]  }
  0x3b   :  { %1219 = vmatprep.subr.bf16.mxu1 %v1360_v5  ;;  %v1368_v13 = vld [vmem:[#allocation5 + $0xe0] sm:$0xff]   ;;  %v1372_v17 = vld [vmem:[#allocation5 + $0xd8] sm:$0xff]   ;;  %v1375_v20 = vld [vmem:[#allocation5 + $0x50] sm:$0xff]   ;;  %v1630_v37 = vsub.s32 %v105_v31, %v107_v32 }
  0x3c   :  { %v1369_v14 = vld [vmem:[#allocation5 + $0x20] sm:$0xff]   ;;  %v1373_v18 = vld [vmem:[#allocation5 + $0x18] sm:$0xff]   ;;  %v1376_v21 = vld [vmem:[#allocation5 + $0xd0] sm:$0xff]  }
  0x3d   :  { %1198 = vmatpush3.bf16.msra.mxu0 %v1361_v6  ;;  %v1370_v15 = vld [vmem:[#allocation5 + $0xa0] sm:$0xff]   ;;  %v1374_v19 = vld [vmem:[#allocation5 + $0x98] sm:$0xff]   ;;  %v1377_v22 = vld [vmem:[#allocation5 + $0x10] sm:$0xff]  }
  0x3e   :  { %1220 = vmatpush3.bf16.msra.mxu1 %v1362_v7  ;;  %1199 = vmatprep.subr.bf16.mxu0 %v1363_v8  ;;  %v1378_v23 = vld [vmem:[#allocation5 + $0x90] sm:$0xff]   ;;  %v1379_v27 = vld [vmem:[#allocation5 + $0x48] sm:$0xff]   ;;  %v1383_v33 = vld [vmem:[#allocation5 + $0x40] sm:$0xff]  }
  0x3f   :  { %1221 = vmatprep.subr.bf16.mxu1 %v1364_v9  ;;  %v1380_v28 = vld [vmem:[#allocation5 + $0xc8] sm:$0xff]   ;;  %v1384_v34 = vld [vmem:[#allocation5 + $0xc0] sm:$0xff]   ;;  %v1393_v44 = vld [vmem:[#allocation5 + $0x178] sm:$0xff]  }
  0x40   :  { %v1381_v29 = vld [vmem:[#allocation5 + $0x8] sm:$0xff]   ;;  %v1385_v35 = vld [vmem:[#allocation5] sm:$0xff]   ;;  %v1394_v47 = vld [vmem:[#allocation5 + $0x1f8] sm:$0xff]  }
  0x41   :  { %1200 = vmatpush3.bf16.msra.mxu0 %v1365_v10  ;;  %v1382_v30 = vld [vmem:[#allocation5 + $0x88] sm:$0xff]   ;;  %v1386_v36 = vld [vmem:[#allocation5 + $0x80] sm:$0xff]   ;;  %v1395_v50 = vld [vmem:[#allocation5 + $0x138] sm:$0xff]  }
  0x42   :  { %1222 = vmatpush3.bf16.msra.mxu1 %v1366_v11  ;;  %1201 = vmatprep.subr.bf16.mxu0 %v1367_v12  ;;  %v1387_v38 = vld [vmem:[#allocation2] ss:$16 sps:$4 sm:$0xff]   ;;  %v1391_v40 = vld [vmem:[#allocation2 + $0x4] ss:$16 sps:$4 sm:$0xff]   ;;  %v1396_v53 = vld [vmem:[#allocation5 + $0x1b8] sm:$0xff]  }
  0x43   :  { %1223 = vmatprep.subr.bf16.mxu1 %v1368_v13  ;;  %v1389_v39 = vld [vmem:[#allocation2 + $0x20] ss:$16 sps:$4 sm:$0xff]   ;;  %v1392_v41 = vld [vmem:[#allocation2 + $0x24] ss:$16 sps:$4 sm:$0xff]   ;;  %v109_v42 = vrot.slane %v1387_v38, %v1630_v37  ;;  %v116_v45 = vrot.slane %v1391_v40, %v1630_v37  ;;  %v1401_v62 = vld [vmem:[#allocation5 + $0x168] sm:$0xff]   ;;  %v1564_v40 = vmov 0.0  }
  0x44   :  { %v123_v43 = vrot.slane %v1389_v39, %v1630_v37  ;;  %v130_v46 = vrot.slane %v1392_v41, %v1630_v37  ;;  %v1397_v56 = vld [vmem:[#allocation5 + $0x170] sm:$0xff]   ;;  %v1402_v63 = vld [vmem:[#allocation5 + $0x1e8] sm:$0xff]   ;;  %v1405_v2 = vld [vmem:[#allocation5 + $0x160] sm:$0xff]  }
  0x45   :  { %1202 = vmatpush3.bf16.msra.mxu0 %v1369_v14  ;;  %v1398_v59 = vld [vmem:[#allocation5 + $0x1f0] sm:$0xff]   ;;  %v1403_v0 = vld [vmem:[#allocation5 + $0x128] sm:$0xff]   ;;  %v1406_v3 = vld [vmem:[#allocation5 + $0x1e0] sm:$0xff]  }
  0x46   :  { %1224 = vmatpush3.bf16.msra.mxu1 %v1370_v15  ;;  %1203 = vmatprep.subr.bf16.mxu0 %v1371_v16  ;;  %v132_v48 = vcombine.high %v109_v42, %v123_v43  ;;  %v131_v49 = vcombine.low %v109_v42, %v123_v43  ;;  %v134_v51 = vcombine.high %v116_v45, %v130_v46  ;;  %v1399_v60 = vld [vmem:[#allocation5 + $0x130] sm:$0xff]   ;;  %v1404_v1 = vld [vmem:[#allocation5 + $0x1a8] sm:$0xff]   ;;  %v1407_v4 = vld [vmem:[#allocation5 + $0x120] sm:$0xff]  }
  0x47   :  { %1225 = vmatprep.subr.bf16.mxu1 %v1372_v17  ;;  %v133_v52 = vcombine.low %v116_v45, %v130_v46  ;;  %v1400_v61 = vld [vmem:[#allocation5 + $0x1b0] sm:$0xff]   ;;  %v1408_v5 = vld [vmem:[#allocation5 + $0x1a0] sm:$0xff]   ;;  %v1409_v6 = vld [vmem:[#allocation5 + $0x158] sm:$0xff]  }
  0x48   :  { %v180_v54 = vpack.c.bf16 %v132_v48, %v132_v48  ;;  %v179_v55 = vpack.c.bf16 %v131_v49, %v131_v49  ;;  %v182_v57 = vpack.c.bf16 %v134_v51, %v134_v51  ;;  %v1410_v7 = vld [vmem:[#allocation5 + $0x1d8] sm:$0xff]   ;;  %v1413_v10 = vld [vmem:[#allocation5 + $0x150] sm:$0xff]   ;;  %v1417_v14 = vld [vmem:[#allocation5 + $0x148] sm:$0xff]  }
  0x49   :  { %1204 = vmatpush3.bf16.msra.mxu0 %v1373_v18  ;;  %v181_v58 = vpack.c.bf16 %v133_v52, %v133_v52  ;;  %v1411_v8 = vld [vmem:[#allocation5 + $0x118] sm:$0xff]   ;;  %v1414_v11 = vld [vmem:[#allocation5 + $0x1d0] sm:$0xff]   ;;  %v1418_v15 = vld [vmem:[#allocation5 + $0x1c8] sm:$0xff]  }
  0x4a   :  { %1226 = vmatpush3.bf16.msra.mxu1 %v1374_v19  ;;  %1205 = vmatprep.subr.bf16.mxu0 %v1375_v20  ;;  %v1412_v9 = vld [vmem:[#allocation5 + $0x198] sm:$0xff]   ;;  %v1415_v12 = vld [vmem:[#allocation5 + $0x110] sm:$0xff]   ;;  %v1419_v16 = vld [vmem:[#allocation5 + $0x108] sm:$0xff]  }
  0x4b   :  { %1227 = vmatprep.subr.bf16.mxu1 %v1376_v21  ;;  %738 = vmatprep.mubr.bf16.mxu0 %v180_v54  ;;  %v1416_v13 = vld [vmem:[#allocation5 + $0x190] sm:$0xff]   ;;  %v1420_v17 = vld [vmem:[#allocation5 + $0x188] sm:$0xff]   ;;  %v1421_v18 = vld [vmem:[#allocation5 + $0x140] sm:$0xff]  }
  0x4c   :  { %778 = vmatprep.mubr.bf16.mxu1 %v182_v57  ;;  %v1422_v19 = vld [vmem:[#allocation5 + $0x1c0] sm:$0xff]   ;;  %v1429_v24 = vld [vmem:[#allocation2 + $0xc] ss:$16 sps:$4 sm:$0xff]   ;;  %v1440_v48 = vld [vmem:[#allocation8 + $0x30] sm:$0xff]  }
  0x4d   :  { %1206 = vmatpush3.bf16.msra.mxu0 %v1377_v22  ;;  %v1423_v20 = vld [vmem:[#allocation5 + $0x100] sm:$0xff]   ;;  %v1425_v22 = vld [vmem:[#allocation2 + $0x8] ss:$16 sps:$4 sm:$0xff]   ;;  %v1430_v25 = vld [vmem:[#allocation2 + $0x2c] ss:$16 sps:$4 sm:$0xff]  }
  0x4e   :  { %1228 = vmatpush3.bf16.msra.mxu1 %v1378_v23  ;;  %1207 = vmatprep.subr.bf16.mxu0 %v1379_v27  ;;  %v1424_v21 = vld [vmem:[#allocation5 + $0x180] sm:$0xff]   ;;  %v1427_v23 = vld [vmem:[#allocation2 + $0x28] ss:$16 sps:$4 sm:$0xff]   ;;  %v145_v26 = vrot.slane %v1425_v22, %v1630_v37  ;;  %v1444_v52 = vld [vmem:[#allocation8 + $0x10] sm:$0xff]  }
  0x4f   :  { %1229 = vmatprep.subr.bf16.mxu1 %v1380_v28  ;;  %v159_v27 = vrot.slane %v1427_v23, %v1630_v37  ;;  %v152_v28 = vrot.slane %v1429_v24, %v1630_v37  ;;  %v1431_v39 = vld [vmem:[#allocation7 + $0x38] sm:$0xff]   ;;  %v1433_v41 = vld [vmem:[#allocation7 + $0x28] sm:$0xff]   ;;  %v1434_v42 = vld [vmem:[#allocation7 + $0x20] sm:$0xff]  }
  0x50   :  { %v1435_v43 = vld [vmem:[#allocation7 + $0x18] sm:$0xff]   ;;  %v1437_v45 = vld [vmem:[#allocation7 + $0x8] sm:$0xff]   ;;  %v1438_v46 = vld [vmem:[#allocation7] sm:$0xff]  }
  0x51   :  { %1208 = vmatpush3.bf16.msra.mxu0 %v1381_v29  ;;  %v166_v29 = vrot.slane %v1430_v25, %v1630_v37  ;;  %v167_v31 = vcombine.low %v145_v26, %v159_v27  ;;  %v1432_v37 = vld [vmem:[#allocation7 + $0x30] sm:$0xff]   ;;  %v1441_v49 = vld [vmem:[#allocation8 + $0x28] sm:$0xff]   ;;  %v1443_v51 = vld [vmem:[#allocation8 + $0x18] sm:$0xff]  }
  0x52   :  { %1230 = vmatpush3.bf16.msra.mxu1 %v1382_v30  ;;  %1209 = vmatprep.subr.bf16.mxu0 %v1383_v33  ;;  %v168_v30 = vcombine.high %v145_v26, %v159_v27  ;;  %v1186_v26 = vld [vmem:[%s1676_s6] ss:$0 sm:$0xff] }
  0x53   :  { %1231 = vmatprep.subr.bf16.mxu1 %v1384_v34  ;;  %v170_v32 = vcombine.high %v152_v28, %v166_v29  ;;  %v169_v33 = vcombine.low %v152_v28, %v166_v29 }
  0x54   :  { %v184_v34 = vpack.c.bf16 %v168_v30, %v168_v30 }
  0x55   :  { %1210 = vmatpush3.bf16.msra.mxu0 %v1385_v35  ;;  %v183_v35 = vpack.c.bf16 %v167_v31, %v167_v31  ;;  %v185_v38 = vpack.c.bf16 %v169_v33, %v169_v33 }
  0x56   :  { %1232 = vmatpush3.bf16.msra.mxu1 %v1386_v36  ;;  %1239 = vmatprep.subr.bf16.mxu0 %v1393_v44  ;;  %v186_v36 = vpack.c.bf16 %v170_v32, %v170_v32  ;;  %v1436_v44 = vld [vmem:[#allocation7 + $0x10] sm:$0xff]  }
  0x57   :  { %1261 = vmatprep.subr.bf16.mxu1 %v1394_v47  ;;  %v1439_v47 = vld [vmem:[#allocation8 + $0x38] sm:$0xff]  }
  0x58   :  { %739 = vmatmul.mubr.bf16.vlgmr.msra.gmra.mxu0 %v179_v55 }
  0x59   :  { %779 = vmatmul.mubr.bf16.vlgmr.msra.gmra.mxu1 %v181_v58  ;;  %1240 = vmatpush3.bf16.msra.mxu0 %v1395_v50  ;;  %v1442_v50 = vld [vmem:[#allocation8 + $0x20] sm:$0xff]  }
  0x5a   :  { %1262 = vmatpush3.bf16.msra.mxu1 %v1396_v53  ;;  %1241 = vmatprep.subr.bf16.mxu0 %v1397_v56 }
  0x5b   :  { %1263 = vmatprep.subr.bf16.mxu1 %v1398_v59  ;;  %818 = vmatprep.mubr.bf16.mxu0 %v184_v34 }
  0x5c   :  { %858 = vmatprep.mubr.bf16.mxu1 %v186_v36 }
  0x5d   :  { %1242 = vmatpush3.bf16.msra.mxu0 %v1399_v60 }
  0x5e   :  { %1264 = vmatpush3.bf16.msra.mxu1 %v1400_v61  ;;  %1243 = vmatprep.subr.bf16.mxu0 %v1401_v62  ;;  %v1112_v62 = vld [vmem:[%s1672_s2] ss:$0 sm:$0xff] }
  0x5f   :  { %1265 = vmatprep.subr.bf16.mxu1 %v1402_v63 }
  0x61   :  { %1244 = vmatpush3.bf16.msra.mxu0 %v1403_v0 }
  0x62   :  { %1266 = vmatpush3.bf16.msra.mxu1 %v1404_v1  ;;  %1245 = vmatprep.subr.bf16.mxu0 %v1405_v2 }
  0x63   :  { %1267 = vmatprep.subr.bf16.mxu1 %v1406_v3 }
  0x65   :  { %1246 = vmatpush3.bf16.msra.mxu0 %v1407_v4 }
  0x66   :  { %1268 = vmatpush3.bf16.msra.mxu1 %v1408_v5  ;;  %1247 = vmatprep.subr.bf16.mxu0 %v1409_v6 }
  0x67   :  { %1269 = vmatprep.subr.bf16.mxu1 %v1410_v7 }
  0x69   :  { %1248 = vmatpush3.bf16.msra.mxu0 %v1411_v8 }
  0x6a   :  { %1270 = vmatpush3.bf16.msra.mxu1 %v1412_v9  ;;  %1249 = vmatprep.subr.bf16.mxu0 %v1413_v10 }
  0x6b   :  { %1271 = vmatprep.subr.bf16.mxu1 %v1414_v11 }
  0x6d   :  { %1250 = vmatpush3.bf16.msra.mxu0 %v1415_v12 }
  0x6e   :  { %1272 = vmatpush3.bf16.msra.mxu1 %v1416_v13  ;;  %1251 = vmatprep.subr.bf16.mxu0 %v1417_v14 }
  0x6f   :  { %1273 = vmatprep.subr.bf16.mxu1 %v1418_v15 }
  0x71   :  { %1252 = vmatpush3.bf16.msra.mxu0 %v1419_v16  ;;  %v1445_v16 = vld [vmem:[#allocation8 + $0x8] sm:$0xff]  }
  0x72   :  { %1274 = vmatpush3.bf16.msra.mxu1 %v1420_v17  ;;  %1253 = vmatprep.subr.bf16.mxu0 %v1421_v18  ;;  %v1446_v17 = vld [vmem:[#allocation8] sm:$0xff]  }
  0x73   :  { %1275 = vmatprep.subr.bf16.mxu1 %v1422_v19  ;;  %v1177_v18 = vld [vmem:[%s1674_s4] ss:$0 sm:$0xff] }
  0x75   :  { %1254 = vmatpush3.bf16.msra.mxu0 %v1423_v20 }
  0x76   :  { %1276 = vmatpush3.bf16.msra.mxu1 %v1424_v21  ;;  %1301 = vmatprep.subr.bf16.mxu0 %v1564_v40 }
  0x77   :  { %1321 = vmatprep.subr.bf16.mxu1 %v1564_v40 }
  0x78   :  { %819 = vmatmul.mubr.bf16.vlgmr.msra.gmra.mxu0 %v183_v35 }
  0x79   :  { %859 = vmatmul.mubr.bf16.vlgmr.msra.gmra.mxu1 %v185_v38  ;;  %1302 = vmatpush3.bf16.msra.mxu0 %v1431_v39 }
  0x7a   :  { %1303 = vmatprep.subr.bf16.mxu0 %v1564_v40  ;;  %1317 = vmatprep.mubr.msk.bf16.mxu0 %vm1565_vm0, %v1564_v40 }
  0x7b   :  { %1337 = vmatprep.mubr.msk.bf16.mxu1 %vm1565_vm0, %v1564_v40  ;;  %1322 = vmatpush3.bf16.msra.mxu1 %v1439_v47 }
  0x7c   :  { %1323 = vmatprep.subr.bf16.mxu1 %v1564_v40 }
  0x7d   :  { %1304 = vmatpush3.bf16.msra.mxu0 %v1432_v37 }
  0x7e   :  { %1305 = vmatprep.subr.bf16.mxu0 %v1564_v40 }
  0x7f   :  { %1324 = vmatpush3.bf16.msra.mxu1 %v1440_v48 }
  0x80   :  { %1325 = vmatprep.subr.bf16.mxu1 %v1564_v40 }
  0x81   :  { %1306 = vmatpush3.bf16.msra.mxu0 %v1433_v41 }
  0x82   :  { %1307 = vmatprep.subr.bf16.mxu0 %v1564_v40 }
  0x83   :  { %1326 = vmatpush3.bf16.msra.mxu1 %v1441_v49 }
  0x84   :  { %1327 = vmatprep.subr.bf16.mxu1 %v1564_v40 }
  0x85   :  { %1308 = vmatpush3.bf16.msra.mxu0 %v1434_v42 }
  0x86   :  { %1309 = vmatprep.subr.bf16.mxu0 %v1564_v40 }
  0x87   :  { %1328 = vmatpush3.bf16.msra.mxu1 %v1442_v50 }
  0x88   :  { %1329 = vmatprep.subr.bf16.mxu1 %v1564_v40 }
  0x89   :  { %1310 = vmatpush3.bf16.msra.mxu0 %v1435_v43 }
  0x8a   :  { %1311 = vmatprep.subr.bf16.mxu0 %v1564_v40 }
  0x8b   :  { %1330 = vmatpush3.bf16.msra.mxu1 %v1443_v51 }
  0x8c   :  { %1331 = vmatprep.subr.bf16.mxu1 %v1564_v40 }
  0x8d   :  { %1312 = vmatpush3.bf16.msra.mxu0 %v1436_v44 }
  0x8e   :  { %1313 = vmatprep.subr.bf16.mxu0 %v1564_v40 }
  0x8f   :  { %1332 = vmatpush3.bf16.msra.mxu1 %v1444_v52 }
  0x90   :  { %1333 = vmatprep.subr.bf16.mxu1 %v1564_v40 }
  0x91   :  { %1314 = vmatpush3.bf16.msra.mxu0 %v1437_v45 }
  0x92   :  { %1315 = vmatprep.subr.bf16.mxu0 %v1564_v40 }
  0x93   :  { %1334 = vmatpush3.bf16.msra.mxu1 %v1445_v16 }
  0x94   :  { %1335 = vmatprep.subr.bf16.mxu1 %v1564_v40 }
  0x95   :  { %1316 = vmatpush3.bf16.msra.mxu0 %v1438_v46 }
  0x97   :  { %1336 = vmatpush3.bf16.msra.mxu1 %v1446_v17 }
 0x118   :  { %v1211_v53 = vpop.f32.mrf.mxu0 }
 0x119   :  { %v1233_v54 = vpop.f32.mrf.mxu1 }
 0x11a   :  { %v1212_v55 = vpop.f32.mrf.mxu0 }
 0x11b   :  { %v1234_v56 = vpop.f32.mrf.mxu1  ;;  %v1213_v61 = vadd.f32 %v1212_v55, %v1211_v53 }
 0x11c   :  { %v1214_v57 = vpop.f32.mrf.mxu0  ;;  %v1235_v0 = vadd.f32 %v1234_v56, %v1233_v54 }
 0x11d   :  { %v1236_v58 = vpop.f32.mrf.mxu1  ;;  %v741_v63 = vadd.f32 %v1213_v61, %v1112_v62 }
 0x11e   :  { %v1215_v59 = vpop.f32.mrf.mxu0 }
 0x11f   :  { %v1237_v60 = vpop.f32.mrf.mxu1  ;;  %v781_v4 = vadd.f32 %v1235_v0, %v741_v63 }
 0x138   :  { %v1255_v1 = vpop.f32.mrf.mxu0 }
 0x139   :  { %v1277_v2 = vpop.f32.mrf.mxu1 }
 0x13a   :  { %v1256_v3 = vpop.f32.mrf.mxu0 }
 0x13b   :  { %v1257_v5 = vadd.f32 %v1256_v3, %v1255_v1  ;;  %v1278_v6 = vpop.f32.mrf.mxu1 }
 0x13c   :  { %v1258_v7 = vpop.f32.mrf.mxu0  ;;  %v1279_v9 = vadd.f32 %v1278_v6, %v1277_v2 }
 0x13d   :  { %v821_v8 = vadd.f32 %v1257_v5, %v781_v4  ;;  %v1280_v10 = vpop.f32.mrf.mxu1 }
 0x13e   :  { %v1259_v11 = vpop.f32.mrf.mxu0 }
 0x13f   :  { %v861_v12 = vadd.f32 %v1279_v9, %v821_v8  ;;  %v1281_v13 = vpop.f32.mrf.mxu1 }
 0x141   :  { %v866_v14 = vmax.f32 %v861_v12, 0.0 }
 0x143   :  { %v867_v15 = vpack.c.bf16 %v866_v14, %v866_v14 }
 0x145   :  { %1318 = vmatmul.mubr.bf16.vlgmr.msra.gmra.mxu0 %v867_v15 }
 0x205   :  { %v973_v19 = vpop.f32.mrf.mxu0 }
 0x206   :  { %v974_v20 = vadd.f32 %v1177_v18, %v973_v19 }
 0x207   :  { %v1319_v21 = vpop.f32.mrf.mxu0 }
 0x208   :  { %v979_v22 = vmax.f32 %v974_v20, 0.0 }
 0x209   :  { %v976_v23 = vpop.f32.mrf.mxu0 }
 0x20a   :  { %v980_v24 = vpack.c.bf16 %v979_v22, %v979_v22 }
 0x20b   :  { %v1320_v25 = vpop.f32.mrf.mxu0 }
 0x20c   :  { %1338 = vmatmul.mubr.bf16.vlgmr.msra.gmra.mxu1 %v980_v24 }
 0x2cc   :  { %v1086_v27 = vpop.f32.mrf.mxu1 }
 0x2cd   :  { %v1087_v28 = vadd.f32 %v1186_v26, %v1086_v27 }
 0x2ce   :  { %v1339_v29 = vpop.f32.mrf.mxu1 }
 0x2cf   :  { %1092 = vst [vmem:[#allocation10] sm:$0xff] %v1087_v28 }
 0x2d0   :  { %v1089_v30 = vpop.f32.mrf.mxu1 }
 0x2d2   :  { %v1340_v31 = vpop.f32.mrf.mxu1 }
 0x2d3   :  { %1097 = vsyncadd [#allocation4], 96  ;;  %s1566_s4 = smov [#allocation10]  }
 0x2d4   :  { %s1098_s27 = sshll.u32 %s1566_s4, 4  ;;  %s1099_s27 = int_to_ptr.vmem [resolvable:$true] %s1098_s27 }
 0x2d5   :  { %s1527_s28 = scalar_lea.vmem %s1099_s27, 32  ;;  %s1531_s29 = scalar_lea.vmem %s1099_s27, 128 }
 0x2d6   :  { %p1528_p6 = scmp.ne.s32.totalorder %s1099_s27, %s1527_s28  ;;  %p1532_p7 = scmp.lt.s32.totalorder %s1099_s27, %s1099_s27 }
 0x2d7   :  { %p1533_p8 = scmp.lt.s32.totalorder %s1531_s29, %s1527_s28 }
 0x2d9   :  { %p1534_p9 = por %p1533_p8, %p1532_p7 }
 0x2db   :  { %p1535_p10 = pnand %p1534_p9, %p1528_p6 }
 0x2dd   :  { %1538 = shalt.err (!%p1535_p10)
}
 0x2de   :  { %s1567_s30 = smov 32   ;;  %s1568_s6 = smov 2  }
 0x2df   :  { %1104 = dma.vmem_to_hbm [thread:$0]  %s1099_s27, 32, %s1677_s7, [#allocation4], %s1567_s30, %s1567_s30, %s1568_s6  }
 0x2e0   :  { %1553 = dma.done.wait [#allocation4], 128  }
 0x2e1   :  { %1554 = vsyncadd [#allocation4], 4294967168 }
 0x2e2   :  { %1108 = vsyncpa [#allocation3], 1 }
 0x2e3   :  { %1109 = vsyncpa [#allocation6], 1 }
 0x2e4   :  { %1110 = vsyncpa [#allocation9], 1 }
 0x2e5   :  { %1111 = vsyncpa [#allocation4], 1 }

</bundles_post_ra>
